<compile_context>
chip_gen: v7x
topology: tpu7x:2x2x1
jax: 0.10.0
libtpu: 0.0.40
codegen_flags: <defaults>
</compile_context>

<pallas_src>
import numpy as np
import jax
import jax.numpy as jnp
from jax.experimental import pallas as pl
from jax.experimental.pallas import tpu as pltpu


CFG = dict(
    num_patches=(4, 4),        # patches per spatial dim
    base_patch_size=(4, 4),    # pixels per patch
    emb_dim=32,
    num_layer=2,
    num_head=2,
    input_channels=4,
    # TODO(synk): context_pixels > 0 (overlapping conv windows) not implemented;
    # the module default [0, 0, 0] is used, where the conv reduces to a matmul.
)


# ----------------------------------------------------------------------------
# Fused Pallas kernel: patch-embed + pos/cls + transformer Block (per grid
# step = one layer, streamed weights) + final LayerNorm.
# ----------------------------------------------------------------------------
def _make_mae_kernel(B, T_pad, nT, num_head):
    """Static config: batch B, padded tokens/batch T_pad, real tokens nT."""

    def kernel(xpix_ref, add_ref, pew_ref, wqpf_ref, wfc2_ref,
               vecs_ref, fc1b_ref, fin_ref, o_ref, xtok_ref):
        l = pl.program_id(0)
        L = pl.num_programs(0)
        C = add_ref.shape[-1]
        D = C // num_head
        BT = B * T_pad

        def layer_norm(v, g, b, eps=1e-5):
            mu = jnp.mean(v, axis=-1, keepdims=True)
            var = jnp.mean(jnp.square(v - mu), axis=-1, keepdims=True)
            return (v - mu) * jax.lax.rsqrt(var + eps) * g + b

        # --- patch embedding (first grid step only) -------------------------
        # xpix rows: [cls slot (zeros) | nv visible patches | pad zeros] x B.
        # add_slab rows: [cls | pos+conv_bias | zeros] x B, built in wrapper.
        @pl.when(l == 0)
        def _():
            xtok_ref[...] = (
                jnp.dot(xpix_ref[...], pew_ref[...],
                        preferred_element_type=jnp.float32) + add_ref[...])

        wl = wqpf_ref[...]            # (C, 8C) bf16: [qkv(Q pre-scaled) | proj | fc1]
        vl = vecs_ref[...]            # (8, C)  f32: ln1_g/b, ln2_g/b, proj_b, fc2_b
        x = xtok_ref[...]             # (BT, C) f32 token slab

        # additive mask for padded key slots (token index >= nT)
        neg = jnp.where(
            jax.lax.broadcasted_iota(jnp.int32, (1, 1, T_pad), 2) < nT,
            0.0, -1e30).astype(jnp.float32)

        # --- Attention block: x = x + proj(attn(norm1(x))) ------------------
        h = layer_norm(x, vl[0:1, :], vl[1:2, :])
        qkv = jnp.dot(h.astype(jnp.bfloat16), wl[:, :3 * C],
                      preferred_element_type=jnp.float32)          # (BT, 3C)
        qkv = qkv.reshape(B, T_pad, 3 * C)

        attn = jnp.zeros((BT, C), jnp.float32)
        for hd in range(num_head):                                  # small static unroll
            q = qkv[:, :, hd * D:(hd + 1) * D].astype(jnp.bfloat16)
            k = qkv[:, :, C + hd * D:C + (hd + 1) * D].astype(jnp.bfloat16)
            v = qkv[:, :, 2 * C + hd * D:2 * C + (hd + 1) * D].astype(jnp.bfloat16)
            s = jnp.einsum('bqd,bkd->bqk', q, k,
                           preferred_element_type=jnp.float32)      # scale folded into Wq
            s = s + neg
            s = s - jnp.max(s, axis=-1, keepdims=True)
            p = jnp.exp(s)
            p = p * pl.reciprocal(jnp.sum(p, axis=-1, keepdims=True), approx=True)
            oh = jnp.einsum('bqk,bkd->bqd', p.astype(jnp.bfloat16), v,
                            preferred_element_type=jnp.float32)     # (B, T_pad, D)
            # head-decomposed output projection (no lane concat of heads)
            attn = attn + jnp.dot(
                oh.reshape(BT, D).astype(jnp.bfloat16),
                wl[hd * D:(hd + 1) * D, 3 * C:4 * C],
                preferred_element_type=jnp.float32)
        x = x + attn + vl[4:5, :]                                   # + proj bias

        # --- MLP block: x = x + fc2(gelu(fc1(norm2(x)))) ---------------------
        h = layer_norm(x, vl[2:3, :], vl[3:4, :])
        h = jnp.dot(h.astype(jnp.bfloat16), wl[:, 4 * C:],
                    preferred_element_type=jnp.float32) + fc1b_ref[...]
        # TODO(synk): timm Block uses exact erf-GELU; tanh-approx GELU used
        # here (Mosaic-safe), numerical delta ~1e-3.
        h = jax.nn.gelu(h, approximate=True)
        h = jnp.dot(h.astype(jnp.bfloat16), wfc2_ref[...],
                    preferred_element_type=jnp.float32) + vl[5:6, :]
        x = x + h
        xtok_ref[...] = x

        # --- final MAE_Encoder LayerNorm + store (last layer only) ----------
        @pl.when(l == L - 1)
        def _():
            o_ref[...] = layer_norm(x, fin_ref[0:1, :], fin_ref[1:2, :]).astype(
                o_ref.dtype)

    return kernel


def mae_fused_encode(x_pix, add_slab, params, *, num_head, T_pad, nT):
    """x_pix: (B*T_pad, K_pad) bf16 im2col pixels; add_slab: (B*T_pad, E) f32."""
    BT, K_pad = x_pix.shape
    E = add_slab.shape[-1]
    L = params["wqpf"].shape[0]
    B = BT // T_pad

    in_specs = [
        pl.BlockSpec((BT, K_pad), lambda l: (0, 0)),            # pixels (DMA'd once)
        pl.BlockSpec((BT, E), lambda l: (0, 0)),                # cls/pos additive slab
        pl.BlockSpec((K_pad, E), lambda l: (0, 0)),             # patch-embed weight
        pl.BlockSpec((None, E, 8 * E), lambda l: (l, 0, 0)),    # [qkv|proj|fc1], streamed
        pl.BlockSpec((None, 4 * E, E), lambda l: (l, 0, 0)),    # fc2, streamed
        pl.BlockSpec((None, 8, E), lambda l: (l, 0, 0)),        # per-layer LN/bias vecs
        pl.BlockSpec((None, 1, 4 * E), lambda l: (l, 0, 0)),    # fc1 bias
        pl.BlockSpec((8, E), lambda l: (0, 0)),                 # final LN gamma/beta
    ]
    return pl.pallas_call(
        _make_mae_kernel(B, T_pad, nT, num_head),
        out_shape=jax.ShapeDtypeStruct((BT, E), jnp.float32),
        grid_spec=pltpu.PrefetchScalarGridSpec(
            num_scalar_prefetch=0,
            grid=(L,),
            in_specs=in_specs,
            out_specs=pl.BlockSpec((BT, E), lambda l: (0, 0)),
            scratch_shapes=[pltpu.VMEM((BT, E), jnp.float32)],   # resident token slab
        ),
        compiler_params=pltpu.CompilerParams(
            dimension_semantics=("arbitrary",),                   # layer axis = reduction
            vmem_limit_bytes=32 * 1024 * 1024,
        ),
    )(x_pix, add_slab, params["pe_w"], params["wqpf"], params["wfc2"],
      params["vecs"], params["fc1_b"], params["finals"])


# ----------------------------------------------------------------------------
# Parameter construction (deterministic, packed layouts for the fused kernel)
# ----------------------------------------------------------------------------
def init_params(key, cfg):
    E = cfg["emb_dim"]
    L = cfg["num_layer"]
    Hh = cfg["num_head"]
    C_in = cfg["input_channels"]
    Py, Px = cfg["base_patch_size"]
    Np = int(np.prod(cfg["num_patches"]))
    K = C_in * Py * Px
    K_pad = ((K + 127) // 128) * 128
    D = E // Hh

    ks = jax.random.split(key, 8)

    def tn(k, shape, std=0.02):
        return (std * jax.random.truncated_normal(k, -2.0, 2.0, shape)).astype(
            jnp.float32)

    cls = tn(ks[0], (1, E))                       # trunc_normal_(std=0.02)
    pos = tn(ks[1], (Np, E))
    pe_w = tn(ks[2], (K, E), std=0.05)            # conv weight, im2col'd: (K, E)
    pe_w = jnp.zeros((K_pad, E), jnp.float32).at[:K].set(pe_w)   # lane-dense pad

    qkv_w = tn(ks[3], (L, E, 3 * E))
    # fold the 1/sqrt(D) attention scale into the Q columns (free at init time)
    qkv_w = qkv_w.at[:, :, :E].multiply(1.0 / float(D) ** 0.5)
    proj_w = tn(ks[4], (L, E, E))
    fc1_w = tn(ks[5], (L, E, 4 * E))
    fc2_w = tn(ks[6], (L, 4 * E, E))

    wqpf = jnp.concatenate([qkv_w, proj_w, fc1_w], axis=-1)       # (L, E, 8E)

    # TODO(synk): timm Block default has qkv_bias=False; no qkv bias is packed.
    vecs = jnp.zeros((L, 8, E), jnp.float32)
    vecs = vecs.at[:, 0].set(1.0)                 # ln1 gamma (beta row 1 = 0)
    vecs = vecs.at[:, 2].set(1.0)                 # ln2 gamma (beta row 3 = 0)
    # row 4 = proj bias (0), row 5 = fc2 bias (0), rows 6-7 = pad

    finals = jnp.zeros((8, E), jnp.float32).at[0].set(1.0)        # LN gamma / beta

    return {
        "pe_w": pe_w.astype(jnp.bfloat16),
        "pos": pos,
        "cls": cls,
        "conv_b": jnp.zeros((1, E), jnp.float32),
        "wqpf": wqpf.astype(jnp.bfloat16),
        "wfc2": fc2_w.astype(jnp.bfloat16),
        "vecs": vecs,
        "fc1_b": jnp.zeros((L, 1, 4 * E), jnp.float32),
        "finals": finals,
    }


# ----------------------------------------------------------------------------
# Forward pass (glue: im2col, masking, index generation, padded slab build)
# ----------------------------------------------------------------------------
def mae_encoder_forward(params, img, mask_ratio=0.75, perm_key=None, cfg=CFG):
    B, C_in, H, W = img.shape
    Hp, Wp = cfg["num_patches"]
    Py, Px = cfg["base_patch_size"]
    E = cfg["emb_dim"]
    Np = Hp * Wp
    K = C_in * Py * Px
    K_pad = params["pe_w"].shape[0]

    # im2col with kernel == stride (context_pixels == 0): conv == matmul
    xcol = img.reshape(B, C_in, Hp, Py, Wp, Px).transpose(0, 2, 4, 1, 3, 5)
    xcol = xcol.reshape(B, Np, K)

    pos = params["pos"]
    forward_indexes = backward_indexes = None
    mask_img = jnp.ones((B, 1, H, W), jnp.float32)

    if mask_ratio > 0:
        n_visible = int(Np * (1 - mask_ratio))
        if perm_key is None:
            perm_key = jax.random.PRNGKey(42)
        perms = [jax.random.permutation(jax.random.fold_in(perm_key, b), Np)
                 for b in range(B)]
        forward_indexes = jnp.stack(perms, axis=-1).astype(jnp.int32)        # (Np, B)
        backward_indexes = jnp.argsort(forward_indexes, axis=0).astype(jnp.int32)

        # per-patch visibility mask scattered back to image layout (patch2img)
        mask_tok = jnp.broadcast_to(
            (jnp.arange(Np)[:, None, None] < n_visible).astype(jnp.float32),
            (Np, B, 1))
        mask_tok = jnp.take_along_axis(mask_tok, backward_indexes[:, :, None], axis=0)
        mask_grid = mask_tok.reshape(Hp, Wp, B, 1).transpose(2, 3, 0, 1)     # (B,1,Hp,Wp)
        mask_img = jnp.repeat(jnp.repeat(mask_grid, Py, axis=2), Px, axis=3)
        # TODO(synk): exact polarity / bool-cast of the mask returned by cyto_dl's
        # Patchify is not reproduced; here 1 == visible pixel.

        # Gather visible-patch PIXELS (identical to gathering embeddings since
        # the patch conv is per-patch with kernel==stride).
        vis_idx = forward_indexes[:n_visible].T                              # (B, nv)
        xvis = jnp.take_along_axis(xcol, vis_idx[:, :, None], axis=1)        # (B,nv,K)
        posvis = pos[vis_idx]                                                # (B,nv,E)
    else:
        n_visible = Np
        xvis = xcol
        posvis = jnp.broadcast_to(pos[None], (B, Np, E))

    nv = n_visible
    T = nv + 1
    T_pad = ((T + 7) // 8) * 8

    # pixel slab: per batch -> [cls slot (zeros) | nv visible patches | zeros],
    # lane-padded to K_pad so the patch-embed matmul is lane-dense.
    x_pix = jnp.zeros((B, T_pad, K_pad), jnp.float32)
    x_pix = x_pix.at[:, 1:1 + nv, :K].set(xvis)
    x_pix = x_pix.reshape(B * T_pad, K_pad).astype(jnp.bfloat16)

    # additive slab: cls token at row 0, pos-emb + conv bias at visible rows.
    add_slab = jnp.zeros((B, T_pad, E), jnp.float32)
    add_slab = add_slab.at[:, 0, :].set(params["cls"][0])
    add_slab = add_slab.at[:, 1:1 + nv, :].set(posvis + params["conv_b"])
    add_slab = add_slab.reshape(B * T_pad, E)

    out = mae_fused_encode(x_pix, add_slab, params, num_head=cfg["num_head"],
                           T_pad=T_pad, nT=T)                                # (B*T_pad, E)

    # strip sublane padding, single torch-compat transpose: (B,T,E) -> (T,B,E)
    features = out.reshape(B, T_pad, E)[:, :T, :].transpose(1, 0, 2)

    if mask_ratio > 0:
        return features, mask_img, forward_indexes, backward_indexes
    return features


# ----------------------------------------------------------------------------
if __name__ == "__main__":
    key = jax.random.PRNGKey(0)
    k_img, k_param, k_perm = jax.random.split(key, 3)

    B = 2
    C_in = CFG["input_channels"]
    H = CFG["num_patches"][0] * CFG["base_patch_size"][0]
    W = CFG["num_patches"][1] * CFG["base_patch_size"][1]
    img = jax.random.normal(k_img, (B, C_in, H, W), jnp.float32)            # NCHW

    params = init_params(k_param, CFG)
    features, mask, fwd_idx, bwd_idx = mae_encoder_forward(
        params, img, mask_ratio=0.75, perm_key=k_perm)
    jax.block_until_ready(features)

    Np = CFG["num_patches"][0] * CFG["num_patches"][1]
    n_visible = int(Np * 0.25)
    assert features.shape == (n_visible + 1, B, CFG["emb_dim"]), features.shape
    assert mask.shape == (B, 1, H, W), mask.shape
    assert fwd_idx.shape == (Np, B) and bwd_idx.shape == (Np, B)
    assert bool(jnp.all(jnp.isfinite(features)))
    print("KERNEL_OK")
</pallas_src>

<mosaic_0001>
module attributes {stable_mosaic.version = 11 : i64} {
  func.func @kernel(%arg0: i32, %arg1: memref<16x128xbf16, #tpu.memory_space<vmem>>, %arg2: memref<16x32xf32, #tpu.memory_space<vmem>>, %arg3: memref<128x32xbf16, #tpu.memory_space<vmem>>, %arg4: memref<1x32x256xbf16, #tpu.memory_space<vmem>>, %arg5: memref<1x128x32xbf16, #tpu.memory_space<vmem>>, %arg6: memref<1x8x32xf32, #tpu.memory_space<vmem>>, %arg7: memref<1x1x128xf32, #tpu.memory_space<vmem>>, %arg8: memref<8x32xf32, #tpu.memory_space<vmem>>, %arg9: memref<16x32xf32, #tpu.memory_space<vmem>>, %arg10: memref<16x32xf32, #tpu.memory_space<vmem>>) attributes {dimension_semantics = [#tpu.dimension_semantics<arbitrary>], iteration_bounds = array<i64: 2>, scalar_prefetch = 0 : i64, scratch_operands = 1 : i64, tpu.core_type = #tpu.core_type<tc>, window_params = [{pipeline_mode = #tpu.pipeline_mode<synchronous>, transform_indices = @transform_0, window_bounds = array<i64: 16, 128>}, {pipeline_mode = #tpu.pipeline_mode<synchronous>, transform_indices = @transform_1, window_bounds = array<i64: 16, 32>}, {pipeline_mode = #tpu.pipeline_mode<synchronous>, transform_indices = @transform_2, window_bounds = array<i64: 128, 32>}, {transform_indices = @transform_3, window_bounds = array<i64: 1, 32, 256>}, {transform_indices = @transform_4, window_bounds = array<i64: 1, 128, 32>}, {transform_indices = @transform_5, window_bounds = array<i64: 1, 8, 32>}, {transform_indices = @transform_6, window_bounds = array<i64: 1, 1, 128>}, {pipeline_mode = #tpu.pipeline_mode<synchronous>, transform_indices = @transform_7, window_bounds = array<i64: 8, 32>}, {pipeline_mode = #tpu.pipeline_mode<synchronous>, transform_indices = @transform_8, window_bounds = array<i64: 16, 32>}]} {
    %c0_i32 = arith.constant 0 : i32
    %0 = arith.cmpi eq, %arg0, %c0_i32 : i32
    %1 = arith.extui %0 : i1 to i32
    %c0_i32_0 = arith.constant 0 : i32
    %2 = arith.cmpi ne, %1, %c0_i32_0 : i32
    scf.if %2 {
      %c0_46 = arith.constant 0 : index
      %c0_47 = arith.constant 0 : index
      %155 = vector.load %arg1[%c0_46, %c0_47] : memref<16x128xbf16, #tpu.memory_space<vmem>>, vector<16x128xbf16>
      %c0_48 = arith.constant 0 : index
      %c0_49 = arith.constant 0 : index
      %156 = vector.load %arg3[%c0_48, %c0_49] : memref<128x32xbf16, #tpu.memory_space<vmem>>, vector<128x32xbf16>
      %cst_50 = arith.constant dense<0.000000e+00> : vector<16x32xf32>
      %157 = tpu.matmul %155, %156, %cst_50 {dimension_numbers = #tpu.dot_dimension_numbers<[1], [0], [0], [1], [0, 0, 1, 1], [], []>} : vector<16x128xbf16>, vector<128x32xbf16>, vector<16x32xf32> -> vector<16x32xf32>
      %c0_51 = arith.constant 0 : index
      %c0_52 = arith.constant 0 : index
      %158 = vector.load %arg2[%c0_51, %c0_52] : memref<16x32xf32, #tpu.memory_space<vmem>>, vector<16x32xf32>
      %159 = arith.addf %157, %158 : vector<16x32xf32>
      %c0_53 = arith.constant 0 : index
      %c0_54 = arith.constant 0 : index
      %160 = vector.load %arg10[%c0_53, %c0_54] : memref<16x32xf32, #tpu.memory_space<vmem>>, vector<16x32xf32>
      tpu.vector_store %arg10[%c0_53, %c0_54], %159 {strides = array<i32>} : memref<16x32xf32, #tpu.memory_space<vmem>>, vector<16x32xf32>,
    } else {
    }
    %c0 = arith.constant 0 : index
    %c0_1 = arith.constant 0 : index
    %c0_2 = arith.constant 0 : index
    %3 = vector.load %arg4[%c0, %c0_1, %c0_2] : memref<1x32x256xbf16, #tpu.memory_space<vmem>>, vector<1x32x256xbf16>
    %4 = vector.shape_cast %3 : vector<1x32x256xbf16> to vector<32x256xbf16>
    %c0_3 = arith.constant 0 : index
    %c0_4 = arith.constant 0 : index
    %c0_5 = arith.constant 0 : index
    %5 = vector.load %arg6[%c0_3, %c0_4, %c0_5] : memref<1x8x32xf32, #tpu.memory_space<vmem>>, vector<1x8x32xf32>
    %6 = vector.shape_cast %5 : vector<1x8x32xf32> to vector<8x32xf32>
    %c0_6 = arith.constant 0 : index
    %c0_7 = arith.constant 0 : index
    %7 = vector.load %arg10[%c0_6, %c0_7] : memref<16x32xf32, #tpu.memory_space<vmem>>, vector<16x32xf32>
    %8 = tpu.iota {dimensions = array<i32: 2>} : vector<1x1x8xi32>
    %c5_i32 = arith.constant 5 : i32
    %9 = vector.broadcast %c5_i32 : i32 to vector<1x1x8xi32>
    %10 = arith.cmpi slt, %8, %9 : vector<1x1x8xi32>
    %cst = arith.constant 0.000000e+00 : f32
    %cst_8 = arith.constant -1.000000e+30 : f32
    %11 = vector.broadcast %cst : f32 to vector<1x1x8xf32>
    %12 = vector.broadcast %cst_8 : f32 to vector<1x1x8xf32>
    %13 = arith.select %10, %11, %12 : vector<1x1x8xi1>, vector<1x1x8xf32>
    %14 = vector.extract_strided_slice %6 {offsets = [0, 0], sizes = [1, 32], strides = [1, 1]} : vector<8x32xf32> to vector<1x32xf32>
    %15 = vector.extract_strided_slice %6 {offsets = [1, 0], sizes = [1, 32], strides = [1, 1]} : vector<8x32xf32> to vector<1x32xf32>
    %cst_9 = arith.constant dense<0.000000e+00> : vector<16xf32>
    %16 = vector.multi_reduction <add>, %7, %cst_9 [1] : vector<16x32xf32> to vector<16xf32>
    %17 = vector.shape_cast %16 : vector<16xf32> to vector<16x1xf32>
    %cst_10 = arith.constant 3.200000e+01 : f32
    %18 = vector.broadcast %cst_10 : f32 to vector<16x1xf32>
    %19 = arith.divf %17, %18 : vector<16x1xf32>
    %20 = vector.broadcast %19 : vector<16x1xf32> to vector<16x32xf32>
    %21 = arith.subf %7, %20 : vector<16x32xf32>
    %22 = arith.mulf %21, %21 : vector<16x32xf32>
    %cst_11 = arith.constant dense<0.000000e+00> : vector<16xf32>
    %23 = vector.multi_reduction <add>, %22, %cst_11 [1] : vector<16x32xf32> to vector<16xf32>
    %24 = vector.shape_cast %23 : vector<16xf32> to vector<16x1xf32>
    %cst_12 = arith.constant 3.200000e+01 : f32
    %25 = vector.broadcast %cst_12 : f32 to vector<16x1xf32>
    %26 = arith.divf %24, %25 : vector<16x1xf32>
    %27 = vector.broadcast %19 : vector<16x1xf32> to vector<16x32xf32>
    %28 = arith.subf %7, %27 : vector<16x32xf32>
    %cst_13 = arith.constant 9.99999974E-6 : f32
    %29 = vector.broadcast %cst_13 : f32 to vector<16x1xf32>
    %30 = arith.addf %26, %29 : vector<16x1xf32>
    %31 = math.rsqrt %30 : vector<16x1xf32>
    %32 = vector.broadcast %31 : vector<16x1xf32> to vector<16x32xf32>
    %33 = arith.mulf %28, %32 : vector<16x32xf32>
    %34 = vector.broadcast %14 : vector<1x32xf32> to vector<16x32xf32>
    %35 = arith.mulf %33, %34 : vector<16x32xf32>
    %36 = vector.broadcast %15 : vector<1x32xf32> to vector<16x32xf32>
    %37 = arith.addf %35, %36 : vector<16x32xf32>
    %38 = arith.truncf %37 : vector<16x32xf32> to vector<16x32xbf16>
    %39 = vector.extract_strided_slice %4 {offsets = [0, 0], sizes = [32, 96], strides = [1, 1]} : vector<32x256xbf16> to vector<32x96xbf16>
    %cst_14 = arith.constant dense<0.000000e+00> : vector<16x96xf32>
    %40 = tpu.matmul %38, %39, %cst_14 {dimension_numbers = #tpu.dot_dimension_numbers<[1], [0], [0], [1], [0, 0, 1, 1], [], []>} : vector<16x32xbf16>, vector<32x96xbf16>, vector<16x96xf32> -> vector<16x96xf32>
    %41 = vector.shape_cast %40 : vector<16x96xf32> to vector<2x8x96xf32>
    %cst_15 = arith.constant 0.000000e+00 : f32
    %42 = vector.broadcast %cst_15 : f32 to vector<16x32xf32>
    %43 = vector.extract_strided_slice %41 {offsets = [0, 0, 0], sizes = [2, 8, 16], strides = [1, 1, 1]} : vector<2x8x96xf32> to vector<2x8x16xf32>
    %44 = arith.truncf %43 : vector<2x8x16xf32> to vector<2x8x16xbf16>
    %45 = vector.extract_strided_slice %41 {offsets = [0, 0, 32], sizes = [2, 8, 16], strides = [1, 1, 1]} : vector<2x8x96xf32> to vector<2x8x16xf32>
    %46 = arith.truncf %45 : vector<2x8x16xf32> to vector<2x8x16xbf16>
    %47 = vector.extract_strided_slice %41 {offsets = [0, 0, 64], sizes = [2, 8, 16], strides = [1, 1, 1]} : vector<2x8x96xf32> to vector<2x8x16xf32>
    %48 = arith.truncf %47 : vector<2x8x16xf32> to vector<2x8x16xbf16>
    "tpu.trace_start"() <{level = 10 : i32, message = "bqd,bkd->bqk"}> : () -> ()
    %cst_16 = arith.constant dense<0.000000e+00> : vector<2x8x8xf32>
    %49 = tpu.matmul %44, %46, %cst_16 {dimension_numbers = #tpu.dot_dimension_numbers<[2], [2], [1], [1], [0, 0, 0, 1, 1, 1], [0], [0]>} : vector<2x8x16xbf16>, vector<2x8x16xbf16>, vector<2x8x8xf32> -> vector<2x8x8xf32>
    "tpu.trace_stop"() : () -> ()
    %50 = vector.broadcast %13 : vector<1x1x8xf32> to vector<2x8x8xf32>
    %51 = arith.addf %49, %50 : vector<2x8x8xf32>
    %cst_17 = arith.constant dense<0xFF800000> : vector<2x8xf32>
    %52 = vector.multi_reduction <maximumf>, %51, %cst_17 [2] : vector<2x8x8xf32> to vector<2x8xf32>
    %53 = vector.shape_cast %52 : vector<2x8xf32> to vector<2x8x1xf32>
    %54 = vector.broadcast %53 : vector<2x8x1xf32> to vector<2x8x8xf32>
    %55 = arith.subf %51, %54 : vector<2x8x8xf32>
    %56 = math.exp %55 : vector<2x8x8xf32>
    %cst_18 = arith.constant dense<0.000000e+00> : vector<2x8xf32>
    %57 = vector.multi_reduction <add>, %56, %cst_18 [2] : vector<2x8x8xf32> to vector<2x8xf32>
    %58 = vector.shape_cast %57 : vector<2x8xf32> to vector<2x8x1xf32>
    %59 = tpu.reciprocal %58 {approx = true} : vector<2x8x1xf32> -> vector<2x8x1xf32>
    %60 = vector.broadcast %59 : vector<2x8x1xf32> to vector<2x8x8xf32>
    %61 = arith.mulf %56, %60 : vector<2x8x8xf32>
    %62 = arith.truncf %61 : vector<2x8x8xf32> to vector<2x8x8xbf16>
    "tpu.trace_start"() <{level = 10 : i32, message = "bqk,bkd->bqd"}> : () -> ()
    %cst_19 = arith.constant dense<0.000000e+00> : vector<2x8x16xf32>
    %63 = tpu.matmul %62, %48, %cst_19 {dimension_numbers = #tpu.dot_dimension_numbers<[2], [1], [1], [2], [0, 0, 0, 1, 1, 2], [0], [0]>} : vector<2x8x8xbf16>, vector<2x8x16xbf16>, vector<2x8x16xf32> -> vector<2x8x16xf32>
    "tpu.trace_stop"() : () -> ()
    %64 = vector.shape_cast %63 : vector<2x8x16xf32> to vector<16x16xf32>
    %65 = arith.truncf %64 : vector<16x16xf32> to vector<16x16xbf16>
    %66 = vector.extract_strided_slice %4 {offsets = [0, 96], sizes = [16, 32], strides = [1, 1]} : vector<32x256xbf16> to vector<16x32xbf16>
    %cst_20 = arith.constant dense<0.000000e+00> : vector<16x32xf32>
    %67 = tpu.matmul %65, %66, %cst_20 {dimension_numbers = #tpu.dot_dimension_numbers<[1], [0], [0], [1], [0, 0, 1, 1], [], []>} : vector<16x16xbf16>, vector<16x32xbf16>, vector<16x32xf32> -> vector<16x32xf32>
    %68 = arith.addf %42, %67 : vector<16x32xf32>
    %69 = vector.extract_strided_slice %41 {offsets = [0, 0, 16], sizes = [2, 8, 16], strides = [1, 1, 1]} : vector<2x8x96xf32> to vector<2x8x16xf32>
    %70 = arith.truncf %69 : vector<2x8x16xf32> to vector<2x8x16xbf16>
    %71 = vector.extract_strided_slice %41 {offsets = [0, 0, 48], sizes = [2, 8, 16], strides = [1, 1, 1]} : vector<2x8x96xf32> to vector<2x8x16xf32>
    %72 = arith.truncf %71 : vector<2x8x16xf32> to vector<2x8x16xbf16>
    %73 = vector.extract_strided_slice %41 {offsets = [0, 0, 80], sizes = [2, 8, 16], strides = [1, 1, 1]} : vector<2x8x96xf32> to vector<2x8x16xf32>
    %74 = arith.truncf %73 : vector<2x8x16xf32> to vector<2x8x16xbf16>
    "tpu.trace_start"() <{level = 10 : i32, message = "bqd,bkd->bqk"}> : () -> ()
    %cst_21 = arith.constant dense<0.000000e+00> : vector<2x8x8xf32>
    %75 = tpu.matmul %70, %72, %cst_21 {dimension_numbers = #tpu.dot_dimension_numbers<[2], [2], [1], [1], [0, 0, 0, 1, 1, 1], [0], [0]>} : vector<2x8x16xbf16>, vector<2x8x16xbf16>, vector<2x8x8xf32> -> vector<2x8x8xf32>
    "tpu.trace_stop"() : () -> ()
    %76 = vector.broadcast %13 : vector<1x1x8xf32> to vector<2x8x8xf32>
    %77 = arith.addf %75, %76 : vector<2x8x8xf32>
    %cst_22 = arith.constant dense<0xFF800000> : vector<2x8xf32>
    %78 = vector.multi_reduction <maximumf>, %77, %cst_22 [2] : vector<2x8x8xf32> to vector<2x8xf32>
    %79 = vector.shape_cast %78 : vector<2x8xf32> to vector<2x8x1xf32>
    %80 = vector.broadcast %79 : vector<2x8x1xf32> to vector<2x8x8xf32>
    %81 = arith.subf %77, %80 : vector<2x8x8xf32>
    %82 = math.exp %81 : vector<2x8x8xf32>
    %cst_23 = arith.constant dense<0.000000e+00> : vector<2x8xf32>
    %83 = vector.multi_reduction <add>, %82, %cst_23 [2] : vector<2x8x8xf32> to vector<2x8xf32>
    %84 = vector.shape_cast %83 : vector<2x8xf32> to vector<2x8x1xf32>
    %85 = tpu.reciprocal %84 {approx = true} : vector<2x8x1xf32> -> vector<2x8x1xf32>
    %86 = vector.broadcast %85 : vector<2x8x1xf32> to vector<2x8x8xf32>
    %87 = arith.mulf %82, %86 : vector<2x8x8xf32>
    %88 = arith.truncf %87 : vector<2x8x8xf32> to vector<2x8x8xbf16>
    "tpu.trace_start"() <{level = 10 : i32, message = "bqk,bkd->bqd"}> : () -> ()
    %cst_24 = arith.constant dense<0.000000e+00> : vector<2x8x16xf32>
    %89 = tpu.matmul %88, %74, %cst_24 {dimension_numbers = #tpu.dot_dimension_numbers<[2], [1], [1], [2], [0, 0, 0, 1, 1, 2], [0], [0]>} : vector<2x8x8xbf16>, vector<2x8x16xbf16>, vector<2x8x16xf32> -> vector<2x8x16xf32>
    "tpu.trace_stop"() : () -> ()
    %90 = vector.shape_cast %89 : vector<2x8x16xf32> to vector<16x16xf32>
    %91 = arith.truncf %90 : vector<16x16xf32> to vector<16x16xbf16>
    %92 = vector.extract_strided_slice %4 {offsets = [16, 96], sizes = [16, 32], strides = [1, 1]} : vector<32x256xbf16> to vector<16x32xbf16>
    %cst_25 = arith.constant dense<0.000000e+00> : vector<16x32xf32>
    %93 = tpu.matmul %91, %92, %cst_25 {dimension_numbers = #tpu.dot_dimension_numbers<[1], [0], [0], [1], [0, 0, 1, 1], [], []>} : vector<16x16xbf16>, vector<16x32xbf16>, vector<16x32xf32> -> vector<16x32xf32>
    %94 = arith.addf %68, %93 : vector<16x32xf32>
    %95 = arith.addf %7, %94 : vector<16x32xf32>
    %96 = vector.extract_strided_slice %6 {offsets = [4, 0], sizes = [1, 32], strides = [1, 1]} : vector<8x32xf32> to vector<1x32xf32>
    %97 = vector.broadcast %96 : vector<1x32xf32> to vector<16x32xf32>
    %98 = arith.addf %95, %97 : vector<16x32xf32>
    %99 = vector.extract_strided_slice %6 {offsets = [2, 0], sizes = [1, 32], strides = [1, 1]} : vector<8x32xf32> to vector<1x32xf32>
    %100 = vector.extract_strided_slice %6 {offsets = [3, 0], sizes = [1, 32], strides = [1, 1]} : vector<8x32xf32> to vector<1x32xf32>
    %cst_26 = arith.constant dense<0.000000e+00> : vector<16xf32>
    %101 = vector.multi_reduction <add>, %98, %cst_26 [1] : vector<16x32xf32> to vector<16xf32>
    %102 = vector.shape_cast %101 : vector<16xf32> to vector<16x1xf32>
    %cst_27 = arith.constant 3.200000e+01 : f32
    %103 = vector.broadcast %cst_27 : f32 to vector<16x1xf32>
    %104 = arith.divf %102, %103 : vector<16x1xf32>
    %105 = vector.broadcast %104 : vector<16x1xf32> to vector<16x32xf32>
    %106 = arith.subf %98, %105 : vector<16x32xf32>
    %107 = arith.mulf %106, %106 : vector<16x32xf32>
    %cst_28 = arith.constant dense<0.000000e+00> : vector<16xf32>
    %108 = vector.multi_reduction <add>, %107, %cst_28 [1] : vector<16x32xf32> to vector<16xf32>
    %109 = vector.shape_cast %108 : vector<16xf32> to vector<16x1xf32>
    %cst_29 = arith.constant 3.200000e+01 : f32
    %110 = vector.broadcast %cst_29 : f32 to vector<16x1xf32>
    %111 = arith.divf %109, %110 : vector<16x1xf32>
    %112 = vector.broadcast %104 : vector<16x1xf32> to vector<16x32xf32>
    %113 = arith.subf %98, %112 : vector<16x32xf32>
    %cst_30 = arith.constant 9.99999974E-6 : f32
    %114 = vector.broadcast %cst_30 : f32 to vector<16x1xf32>
    %115 = arith.addf %111, %114 : vector<16x1xf32>
    %116 = math.rsqrt %115 : vector<16x1xf32>
    %117 = vector.broadcast %116 : vector<16x1xf32> to vector<16x32xf32>
    %118 = arith.mulf %113, %117 : vector<16x32xf32>
    %119 = vector.broadcast %99 : vector<1x32xf32> to vector<16x32xf32>
    %120 = arith.mulf %118, %119 : vector<16x32xf32>
    %121 = vector.broadcast %100 : vector<1x32xf32> to vector<16x32xf32>
    %122 = arith.addf %120, %121 : vector<16x32xf32>
    %123 = arith.truncf %122 : vector<16x32xf32> to vector<16x32xbf16>
    %124 = vector.extract_strided_slice %4 {offsets = [0, 128], sizes = [32, 128], strides = [1, 1]} : vector<32x256xbf16> to vector<32x128xbf16>
    %cst_31 = arith.constant dense<0.000000e+00> : vector<16x128xf32>
    %125 = tpu.matmul %123, %124, %cst_31 {dimension_numbers = #tpu.dot_dimension_numbers<[1], [0], [0], [1], [0, 0, 1, 1], [], []>} : vector<16x32xbf16>, vector<32x128xbf16>, vector<16x128xf32> -> vector<16x128xf32>
    %c0_32 = arith.constant 0 : index
    %c0_33 = arith.constant 0 : index
    %c0_34 = arith.constant 0 : index
    %126 = vector.load %arg7[%c0_32, %c0_33, %c0_34] : memref<1x1x128xf32, #tpu.memory_space<vmem>>, vector<1x1x128xf32>
    %127 = vector.shape_cast %126 : vector<1x1x128xf32> to vector<1x128xf32>
    %128 = vector.broadcast %127 : vector<1x128xf32> to vector<16x128xf32>
    %129 = arith.addf %125, %128 : vector<16x128xf32>
    %130 = arith.mulf %129, %129 : vector<16x128xf32>
    %131 = arith.mulf %129, %130 : vector<16x128xf32>
    %cst_35 = arith.constant 4.471500e-02 : f32
    %132 = vector.broadcast %cst_35 : f32 to vector<16x128xf32>
    %133 = arith.mulf %132, %131 : vector<16x128xf32>
    %134 = arith.addf %129, %133 : vector<16x128xf32>
    %cst_36 = arith.constant 0.797884583 : f32
    %135 = vector.broadcast %cst_36 : f32 to vector<16x128xf32>
    %136 = arith.mulf %135, %134 : vector<16x128xf32>
    %137 = math.tanh %136 : vector<16x128xf32>
    %cst_37 = arith.constant 1.000000e+00 : f32
    %138 = vector.broadcast %cst_37 : f32 to vector<16x128xf32>
    %139 = arith.addf %138, %137 : vector<16x128xf32>
    %cst_38 = arith.constant 5.000000e-01 : f32
    %140 = vector.broadcast %cst_38 : f32 to vector<16x128xf32>
    %141 = arith.mulf %140, %139 : vector<16x128xf32>
    %142 = arith.mulf %129, %141 : vector<16x128xf32>
    %143 = arith.truncf %142 : vector<16x128xf32> to vector<16x128xbf16>
    %c0_39 = arith.constant 0 : index
    %c0_40 = arith.constant 0 : index
    %c0_41 = arith.constant 0 : index
    %144 = vector.load %arg5[%c0_39, %c0_40, %c0_41] : memref<1x128x32xbf16, #tpu.memory_space<vmem>>, vector<1x128x32xbf16>
    %145 = vector.shape_cast %144 : vector<1x128x32xbf16> to vector<128x32xbf16>
    %cst_42 = arith.constant dense<0.000000e+00> : vector<16x32xf32>
    %146 = tpu.matmul %143, %145, %cst_42 {dimension_numbers = #tpu.dot_dimension_numbers<[1], [0], [0], [1], [0, 0, 1, 1], [], []>} : vector<16x128xbf16>, vector<128x32xbf16>, vector<16x32xf32> -> vector<16x32xf32>
    %147 = vector.extract_strided_slice %6 {offsets = [5, 0], sizes = [1, 32], strides = [1, 1]} : vector<8x32xf32> to vector<1x32xf32>
    %148 = vector.broadcast %147 : vector<1x32xf32> to vector<16x32xf32>
    %149 = arith.addf %146, %148 : vector<16x32xf32>
    %150 = arith.addf %98, %149 : vector<16x32xf32>
    %c0_43 = arith.constant 0 : index
    %c0_44 = arith.constant 0 : index
    %151 = vector.load %arg10[%c0_43, %c0_44] : memref<16x32xf32, #tpu.memory_space<vmem>>, vector<16x32xf32>
    tpu.vector_store %arg10[%c0_43, %c0_44], %150 {strides = array<i32>} : memref<16x32xf32, #tpu.memory_space<vmem>>, vector<16x32xf32>,
    %c1_i32 = arith.constant 1 : i32
    %152 = arith.cmpi eq, %arg0, %c1_i32 : i32
    %153 = arith.extui %152 : i1 to i32
    %c0_i32_45 = arith.constant 0 : i32
    %154 = arith.cmpi ne, %153, %c0_i32_45 : i32
    scf.if %154 {
      %c0_46 = arith.constant 0 : index
      %c0_47 = arith.constant 0 : index
      %155 = vector.load %arg8[%c0_46, %c0_47] : memref<8x32xf32, #tpu.memory_space<vmem>>, vector<1x32xf32>
      %c1 = arith.constant 1 : index
      %c0_48 = arith.constant 0 : index
      %156 = vector.load %arg8[%c1, %c0_48] : memref<8x32xf32, #tpu.memory_space<vmem>>, vector<1x32xf32>
      %cst_49 = arith.constant dense<0.000000e+00> : vector<16xf32>
      %157 = vector.multi_reduction <add>, %150, %cst_49 [1] : vector<16x32xf32> to vector<16xf32>
      %158 = vector.shape_cast %157 : vector<16xf32> to vector<16x1xf32>
      %cst_50 = arith.constant 3.200000e+01 : f32
      %159 = vector.broadcast %cst_50 : f32 to vector<16x1xf32>
      %160 = arith.divf %158, %159 : vector<16x1xf32>
      %161 = vector.broadcast %160 : vector<16x1xf32> to vector<16x32xf32>
      %162 = arith.subf %150, %161 : vector<16x32xf32>
      %163 = arith.mulf %162, %162 : vector<16x32xf32>
      %cst_51 = arith.constant dense<0.000000e+00> : vector<16xf32>
      %164 = vector.multi_reduction <add>, %163, %cst_51 [1] : vector<16x32xf32> to vector<16xf32>
      %165 = vector.shape_cast %164 : vector<16xf32> to vector<16x1xf32>
      %cst_52 = arith.constant 3.200000e+01 : f32
      %166 = vector.broadcast %cst_52 : f32 to vector<16x1xf32>
      %167 = arith.divf %165, %166 : vector<16x1xf32>
      %168 = vector.broadcast %160 : vector<16x1xf32> to vector<16x32xf32>
      %169 = arith.subf %150, %168 : vector<16x32xf32>
      %cst_53 = arith.constant 9.99999974E-6 : f32
      %170 = vector.broadcast %cst_53 : f32 to vector<16x1xf32>
      %171 = arith.addf %167, %170 : vector<16x1xf32>
      %172 = math.rsqrt %171 : vector<16x1xf32>
      %173 = vector.broadcast %172 : vector<16x1xf32> to vector<16x32xf32>
      %174 = arith.mulf %169, %173 : vector<16x32xf32>
      %175 = vector.broadcast %155 : vector<1x32xf32> to vector<16x32xf32>
      %176 = arith.mulf %174, %175 : vector<16x32xf32>
      %177 = vector.broadcast %156 : vector<1x32xf32> to vector<16x32xf32>
      %178 = arith.addf %176, %177 : vector<16x32xf32>
      %c0_54 = arith.constant 0 : index
      %c0_55 = arith.constant 0 : index
      %179 = vector.load %arg9[%c0_54, %c0_55] : memref<16x32xf32, #tpu.memory_space<vmem>>, vector<16x32xf32>
      tpu.vector_store %arg9[%c0_54, %c0_55], %178 {strides = array<i32>} : memref<16x32xf32, #tpu.memory_space<vmem>>, vector<16x32xf32>,
    } else {
    }
    return
  }
  func.func @transform_0(%arg0: i32) -> (i32, i32) {
    %c0_i32 = arith.constant 0 : i32
    %c0_i32_0 = arith.constant 0 : i32
    %c0_i32_1 = arith.constant 0 : i32
    return %c0_i32, %c0_i32_0 : i32, i32
  }
  func.func @transform_1(%arg0: i32) -> (i32, i32) {
    %c0_i32 = arith.constant 0 : i32
    %c0_i32_0 = arith.constant 0 : i32
    %c0_i32_1 = arith.constant 0 : i32
    return %c0_i32, %c0_i32_0 : i32, i32
  }
  func.func @transform_2(%arg0: i32) -> (i32, i32) {
    %c0_i32 = arith.constant 0 : i32
    %c0_i32_0 = arith.constant 0 : i32
    %c0_i32_1 = arith.constant 0 : i32
    return %c0_i32, %c0_i32_0 : i32, i32
  }
  func.func @transform_3(%arg0: i32) -> (i32, i32, i32) {
    %c0_i32 = arith.constant 0 : i32
    %c0_i32_0 = arith.constant 0 : i32
    %c0_i32_1 = arith.constant 0 : i32
    return %arg0, %c0_i32, %c0_i32_0 : i32, i32, i32
  }
  func.func @transform_4(%arg0: i32) -> (i32, i32, i32) {
    %c0_i32 = arith.constant 0 : i32
    %c0_i32_0 = arith.constant 0 : i32
    %c0_i32_1 = arith.constant 0 : i32
    return %arg0, %c0_i32, %c0_i32_0 : i32, i32, i32
  }
  func.func @transform_5(%arg0: i32) -> (i32, i32, i32) {
    %c0_i32 = arith.constant 0 : i32
    %c0_i32_0 = arith.constant 0 : i32
    %c0_i32_1 = arith.constant 0 : i32
    return %arg0, %c0_i32, %c0_i32_0 : i32, i32, i32
  }
  func.func @transform_6(%arg0: i32) -> (i32, i32, i32) {
    %c0_i32 = arith.constant 0 : i32
    %c0_i32_0 = arith.constant 0 : i32
    %c0_i32_1 = arith.constant 0 : i32
    return %arg0, %c0_i32, %c0_i32_0 : i32, i32, i32
  }
  func.func @transform_7(%arg0: i32) -> (i32, i32) {
    %c0_i32 = arith.constant 0 : i32
    %c0_i32_0 = arith.constant 0 : i32
    %c0_i32_1 = arith.constant 0 : i32
    return %c0_i32, %c0_i32_0 : i32, i32
  }
  func.func @transform_8(%arg0: i32) -> (i32, i32) {
    %c0_i32 = arith.constant 0 : i32
    %c0_i32_0 = arith.constant 0 : i32
    %c0_i32_1 = arith.constant 0 : i32
    return %c0_i32, %c0_i32_0 : i32, i32
  }
}

</mosaic_0001>

<bundles_post_ra>
// kernel: tpu_custom_call.1
= control target key start
LH: loop header
LB: loop body
LE: loop exit
PB: predicated region body
PF: predicated region fallthrough
CT: control target
= control target key end

     0   :  { %13 = vsyncpa [#allocation4], 0  ;;  %s1871_s27 = smov 0   ;;  %s2159_s0 = inlined_call_operand.vmem [shape: bf16[16,128], index: 0, kind: input, shape index: {}]   ;;  %s2160_s1 = inlined_call_operand.vmem [shape: f32[16,32], index: 1, kind: input, shape index: {}]   ;;  %s2161_s2 = inlined_call_operand.vmem [shape: bf16[128,32], index: 2, kind: input, shape index: {}]   ;;  %s2162_s3 = inlined_call_operand.vmem [shape: bf16[2,32,256], index: 3, kind: input, shape index: {}]   ;;  %s2163_s4 = inlined_call_operand.vmem [shape: bf16[2,128,32], index: 4, kind: input, shape index: {}]   ;;  %s2164_s5 = inlined_call_operand.vmem [shape: f32[2,8,32], index: 5, kind: input, shape index: {}]   ;;  %s2165_s6 = inlined_call_operand.vmem [shape: f32[2,1,128], index: 6, kind: input, shape index: {}]   ;;  %s2166_s7 = inlined_call_operand.vmem [shape: f32[8,32], index: 7, kind: input, shape index: {}]   ;;  %s2167_s8 = inlined_call_operand.hbm [shape: f32[16,32], index: 8, kind: output, shape index: {}]  }
   0x1 LB: > { %s1877_s28 = sadd.s32 4294967295, %s1810_s27   ;;  %p1481_p0 = scmp.ge.s32.totalorder %s1810_s27, 1  ;;  %s1810_s27 = sphi %s1871_s27, %s19_s27  }
   0x2   : > { %p285_p1 = scmp.lt.s32.totalorder %s1810_s27, 3 }
   0x4   : > { %p286_p2 = pnand %p1481_p0, %p285_p1 }
   0x5   : > { %p326_p3 = scmp.lt.s32.totalorder (!%p286_p2), %s1877_s28, 1  ;;  %p1487_p4 = scmp.ne.s32.totalorder (!%p286_p2), %s1877_s28, 0 }
   0x6   : > { %289 = sbr.rel (%p286_p2) target bundleno = 3557 (0xde5), region = 52 }
   0xd   : > { %s1883_s29 = scalar_select %p326_p3, %s1877_s28, 1 }
   0xe   : > { %347 = sbr.rel (%p1487_p4) target bundleno = 264 (0x108), region = 56  ;;  %v1719_v0 = vld [vmem:[%s2161_s2] sm:$0xff] (!%p1487_p4)   ;;  %v1812_v1 = vmov (!%p1487_p4), 0.0   ;;  %v1720_v2 = vld [vmem:[%s2161_s2 + $0x8] sm:$0xff] (!%p1487_p4)   ;;  %vm1813_vm0 = vmmov (!%p1487_p4), 0   ;;  %v1721_v3 = vld [vmem:[%s2161_s2 + $0x10] sm:$0xff] (!%p1487_p4)  }
   0xf   : > { %s1529_s30 = sshll.u32 %s1883_s29, 5  ;;  %s1530_s9 = sshll.u32 %s1883_s29, 6  ;;  %1575 = vmatprep.subr.bf16.mxu0 (!%p1487_p4), %v1812_v1  ;;  %1591 = vmatprep.mubr.msk.bf16.mxu0 (!%p1487_p4), %vm1813_vm0, %v1812_v1  ;;  %v1722_v4 = vld [vmem:[%s2161_s2 + $0x18] sm:$0xff] (!%p1487_p4)   ;;  %v1723_v5 = vld [vmem:[%s2161_s2 + $0x20] sm:$0xff] (!%p1487_p4)   ;;  %v1724_v6 = vld [vmem:[%s2161_s2 + $0x28] sm:$0xff] (!%p1487_p4)   ;;  %vm463_vm1 = vcmask (!%p1487_p4), 261120  }
  0x10   : > { %s1890_s12 = scalar_lea.vmem %s2162_s3, %s1529_s30  ;;  %s1895_s15 = scalar_lea.vmem %s2163_s4, %s1530_s9  ;;  %1576 = vmatpush3.bf16.msra.mxu0 (!%p1487_p4), %v1719_v0  ;;  %v1725_v7 = vld [vmem:[%s2161_s2 + $0x30] sm:$0xff] (!%p1487_p4)   ;;  %v1726_v8 = vld [vmem:[%s2161_s2 + $0x38] sm:$0xff] (!%p1487_p4)   ;;  %v1727_v9 = vld [vmem:[%s2159_s0] sm:$0xff] (!%p1487_p4)  }
  0x11   : > { %s1486_s16 = sshll.u32 %s1883_s29, 3  ;;  %s342_s19 = scalar_lea.vmem %s2165_s6, %s1883_s29  ;;  %1577 = vmatprep.subr.bf16.mxu0 (!%p1487_p4), %v1812_v1  ;;  %v366_v10 = vld [vmem:[%s2160_s1] sm:$0xff] (!%p1487_p4)  ;;  %v367_v12 = vld [vmem:[%s2160_s1 + $0x8] sm:$0xff] (!%p1487_p4) }
  0x12   : > { %s1905_s22 = scalar_lea.vmem %s2164_s5, %s1486_s16 }
  0x14   : > { %1578 = vmatpush3.bf16.msra.mxu0 (!%p1487_p4), %v1720_v2 }
  0x15   : > { %1579 = vmatprep.subr.bf16.mxu0 %v1812_v1 }
  0x18   : > { %1580 = vmatpush3.bf16.msra.mxu0 %v1721_v3 }
  0x19   : > { %1581 = vmatprep.subr.bf16.mxu0 %v1812_v1 }
  0x1c   : > { %1582 = vmatpush3.bf16.msra.mxu0 %v1722_v4 }
  0x1d   : > { %1583 = vmatprep.subr.bf16.mxu0 %v1812_v1 }
  0x20   : > { %1584 = vmatpush3.bf16.msra.mxu0 %v1723_v5 }
  0x21   : > { %1585 = vmatprep.subr.bf16.mxu0 %v1812_v1 }
  0x24   : > { %1586 = vmatpush3.bf16.msra.mxu0 %v1724_v6 }
  0x25   : > { %1587 = vmatprep.subr.bf16.mxu0 %v1812_v1 }
  0x28   : > { %1588 = vmatpush3.bf16.msra.mxu0 %v1725_v7 }
  0x29   : > { %1589 = vmatprep.subr.bf16.mxu0 %v1812_v1 }
  0x2c   : > { %1590 = vmatpush3.bf16.msra.mxu0 %v1726_v8 }
  0x2f   : > { %1592 = vmatmul.mubr.bf16.vlgmr.msra.gmra.mrb[0].mxu0 %v1727_v9 }
 0x102   : > { %v456_v11 = vpop.f32.mrb[0].mxu0 }
 0x103   : > { %v457_v13 = vadd.f32 %v456_v11, %v366_v10  ;;  %v1593_v14 = vpop.f32.mrb[1].mxu0 }
 0x104   : > { %v459_v15 = vpop.f32.mrb[2].mxu0 }
 0x105   : > { %464 = vst.msk [vmem:[#allocation2] sm:$0xff] %vm463_vm1, %v457_v13  ;;  %v460_v16 = vadd.f32 %v459_v15, %v367_v12  ;;  %v1594_v17 = vpop.f32.mrb[3].mxu0 }
 0x107   : > { %465 = vst.msk [vmem:[#allocation2 + $0x8] sm:$0xff] %vm463_vm1, %v460_v16 }
 0x108 PF: > { %vm477_vm2 = vcmask 261120   ;;  %v1954_v32 = vld [vmem:[%s1890_s12] ss:$8 sps:$4 sm:$0xff]   ;;  %v1814_v33 = vmov 0.0   ;;  %v1960_v34 = vld [vmem:[%s1890_s12 + $0x10] ss:$8 sps:$4 sm:$0xff]   ;;  %v473_v39 = vlaneseq }
 0x109   : > { %1595 = vmatprep.subr.bf16.mxu1 %v1814_v33  ;;  %1621 = vmatprep.subr.bf16.mxu0 %v1814_v33  ;;  %vm1815_vm3 = vmmov 0   ;;  %v1973_v44 = vld [vmem:[%s1905_s22] sm:$0xff]  ;;  %s1816_s22 = smov 96   ;;  %vm579_vm4 = vcmask 130048   ;;  %v1817_v4 = vmov -1e+30  }
 0x10a   : > { %1596 = vmatpush3.bf16.msra.mxu1 %v1954_v32  ;;  %1599 = vmatprep.mubr.msk.bf16.mxu1 %vm1815_vm3, %v1814_v33  ;;  %v1969_v42 = vshrl.u32 %v473_v39, 7  ;;  %v474_v3 = vand.u32 127, %v473_v39  ;;  %vm675_vm6 = vcmask 64512   ;;  %s1818_s11 = smov 64   ;;  %s1819_s13 = smov 80   ;;  %vm705_vm7 = vcmask 1043456  }
 0x10b   : > { %1597 = vmatprep.subr.bf16.mxu1 %v1814_v33  ;;  %1623 = vmatprep.mubr.msk.bf16.mxu0 %vm1815_vm3, %v1814_v33  ;;  %s1820_s14 = smov 112   ;;  %s1821_s16 = smov 48  }
 0x10c   : > { %v1941_v18 = vld [vmem:[#allocation2] sm:$0xff]  ;;  %v507_v43 = vsub.s32 0, %v1969_v42  ;;  %v513_v48 = vsub.s32 1, %v1969_v42  ;;  %vm475_vm5 = vcmp.lt.s32.totalorder %v474_v3, 5  ;;  %s1822_s17 = smov 32   ;;  %p1522_p5 = scmp.ne.s32.totalorder %s1877_s28, 1 }
 0x10d   : > { %v478_v20 = vsel %vm477_vm2, %v1941_v18, 0.0  ;;  %v1999_v5 = vsel %vm475_vm5, 0.0, %v1817_v4 }
 0x10e   : > { %v1943_v19 = vld [vmem:[#allocation2 + $0x8] sm:$0xff]  ;;  %479 = vadd.xlane.f32.xlu0 %v478_v20  ;;  %1598 = vmatpush3.bf16.msra.mxu1 %v1960_v34  ;;  %v508_v47 = vrot.slane %v1973_v44, %v507_v43  ;;  %v514_v52 = vrot.slane %v1973_v44, %v513_v48 }
 0x10f   : > { %v481_v21 = vsel %vm477_vm2, %v1943_v19, 0.0  ;;  %1603 = vmatprep.subr.bf16.mxu1 %v1814_v33 }
 0x112   : > { %482 = vadd.xlane.f32.xlu0 %v481_v21 }
 0x19b   : > { %v480_v22 = vpop.xlane.xlu0 %479 }
 0x19c   : > { %v485_v23 = vmul.f32 0.03125, %v480_v22 }
 0x19e   : > { %v487_v24 = vsub.f32 %v1941_v18, %v485_v23 }
 0x19f   : > { %v483_v25 = vpop.xlane.xlu0 %482 }
 0x1a0   : > { %v486_v26 = vmul.f32 0.03125, %v483_v25  ;;  %v489_v27 = vmul.f32 %v487_v24, %v487_v24 }
 0x1a2   : > { %v488_v28 = vsub.f32 %v1943_v19, %v486_v26  ;;  %v491_v29 = vsel %vm477_vm2, %v489_v27, 0.0 }
 0x1a3   : > { %492 = vadd.xlane.f32.xlu1 %v491_v29 }
 0x1a4   : > { %v490_v30 = vmul.f32 %v488_v28, %v488_v28 }
 0x1a6   : > { %v494_v31 = vsel %vm477_vm2, %v490_v30, 0.0 }
 0x1a7   : > { %495 = vadd.xlane.f32.xlu1 %v494_v31 }
 0x230   : > { %v493_v35 = vpop.xlane.xlu1 %492 }
 0x231   : > { %v497_v36 = vmul.f32 0.03125, %v493_v35 }
 0x233   : > { %v499_v37 = vadd.f32 1e-05, %v497_v36 }
 0x234   : > { %v496_v38 = vpop.xlane.xlu1 %495 }
 0x235   : > { %1742 = vrsqrt.f32 %v499_v37  ;;  %v498_v40 = vmul.f32 0.03125, %v496_v38 }
 0x237   : > { %v500_v41 = vadd.f32 1e-05, %v498_v40 }
 0x239   : > { %1744 = vrsqrt.f32 %v500_v41 }
 0x23f   : > { %v1743_v45 = vpop.eup %1742 }
 0x240   : > { %v503_v46 = vmul.f32 %v1743_v45, %v487_v24 }
 0x242   : > { %v509_v51 = vmul.f32 %v508_v47, %v503_v46 }
 0x243   : > { %v1745_v49 = vpop.eup %1744 }
 0x244   : > { %v504_v50 = vmul.f32 %v1745_v49, %v488_v28  ;;  %v515_v54 = vadd.f32 %v514_v52, %v509_v51 }
 0x246   : > { %v510_v53 = vmul.f32 %v508_v47, %v504_v50 }
 0x248   : > { %v516_v55 = vadd.f32 %v514_v52, %v510_v53 }
 0x24a   : > { %v517_v56 = vpack.c.bf16 %v516_v55, %v515_v54 }
 0x24c   : > { %1600 = vmatmul.mubr.msk.bf16.vlgmr.msra.gmra.mrb[0].mxu1 %vm477_vm2, %v517_v56 }
 0x24d   : > { %1605 = vmatprep.mubr.msk.bf16.mxu1 %vm1815_vm3, %v1814_v33 }
 0x31f   : > { %v567_v57 = vpop.f32.mrb[0].mxu1 }
 0x320   : > { %v1981_v58 = vpack.c.bf16 %v567_v57, %v567_v57  ;;  %v1601_v59 = vpop.f32.mrb[1].mxu1 }
 0x321   : > { %v570_v60 = vpop.f32.mrb[2].mxu1 }
 0x322   : > { %v1983_v61 = vpack.c.bf16 %v570_v60, %v570_v60  ;;  %577 = vrot.lane.b32.xlu0 %v1981_v58, %s1816_s22  ;;  %v1602_v62 = vpop.f32.mrb[3].mxu1 }
 0x324   : > { %627 = vrot.lane.b32.xlu1 %v1983_v61, %s1816_s22 }
 0x394   : > { %v578_v63 = vpop.permute.xlu0 %577 }
 0x395   : > { %v584_v0 = vsel %vm579_vm4, %v578_v63, 0 }
 0x396   : > { %1604 = vmatpush3.bf16.xpose.msra.mxu1 %v584_v0  ;;  %v628_v1 = vpop.permute.xlu1 %627 }
 0x397   : > { %1609 = vmatprep.subr.bf16.mxu1 %v1814_v33  ;;  %v633_v2 = vsel %vm579_vm4, %v628_v1, 0 }
 0x39d   : > { %1606 = vmatmul.mubr.msk.bf16.vlgmr.msra.gmra.mrb[4].mxu1 %vm579_vm4, %v1981_v58 }
 0x39e   : > { %1610 = vmatpush3.bf16.xpose.msra.mxu1 %v633_v2  ;;  %1611 = vmatprep.mubr.msk.bf16.mxu1 %vm1815_vm3, %v1814_v33 }
 0x39f   : > { %1615 = vmatprep.subr.bf16.mxu1 %v1814_v33 }
 0x3a5   : > { %1612 = vmatmul.mubr.msk.bf16.vlgmr.msra.gmra.mrb[8].mxu1 %vm579_vm4, %v1983_v61 }
 0x3a6   : > { %1617 = vmatprep.mubr.msk.bf16.mxu1 %vm1815_vm3, %v1814_v33 }
 0x470   : > { %v620_v6 = vpop.f32.mrb[4].mxu1 }
 0x471   : > { %v621_v7 = vadd.f32 %v620_v6, %v1999_v5  ;;  %v1607_v8 = vpop.f32.mrb[5].mxu1 }
 0x472   : > { %v623_v9 = vpop.f32.mrb[6].mxu1 }
 0x473   : > { %v1608_v10 = vpop.f32.mrb[7].mxu1  ;;  %v676_v11 = vsel %vm675_vm6, %v621_v7, -inf }
 0x474   : > { %677 = vmax.xlane.f32.xlu1 %v676_v11 }
 0x478   : > { %v669_v12 = vpop.f32.mrb[8].mxu1 }
 0x479   : > { %v670_v13 = vadd.f32 %v669_v12, %v1999_v5  ;;  %v1613_v14 = vpop.f32.mrb[9].mxu1 }
 0x47a   : > { %v672_v15 = vpop.f32.mrb[10].mxu1 }
 0x47b   : > { %v1614_v16 = vpop.f32.mrb[11].mxu1  ;;  %v679_v17 = vsel %vm675_vm6, %v670_v13, -inf }
 0x47c   : > { %680 = vmax.xlane.f32.xlu0 %v679_v17 }
 0x485   : > { %749 = vrot.lane.b32.xlu1 %v1983_v61, %s1818_s11 }
 0x489   : > { %800 = vrot.lane.b32.xlu1 %v1981_v58, %s1819_s13 }
 0x501   : > { %v678_v20 = vpop.xlane.xlu1 %677 }
 0x502   : > { %v682_v21 = vsub.f32 %v621_v7, %v678_v20 }
 0x504   : > { %v684_v22 = vmul.f32 1.442695, %v682_v21 }
 0x505   : > { %v750_v23 = vpop.permute.xlu1 %749 }
 0x506   : > { %1746 = vpow2.f32 %v684_v22  ;;  %v755_v24 = vsel %vm705_vm7, %v750_v23, 0 }
 0x507   : > { %1622 = vmatpush3.bf16.msra.mxu0 %v755_v24 }
 0x508   : > { %1633 = vmatprep.subr.bf16.mxu0 %v1814_v33 }
 0x509   : > { %v681_v25 = vpop.xlane.xlu0 %680  ;;  %v801_v36 = vpop.permute.xlu1 %800 }
 0x50a   : > { %v683_v26 = vsub.f32 %v670_v13, %v681_v25  ;;  %v806_v45 = vsel %vm579_vm4, %v801_v36, 0 }
 0x50c   : > { %v686_v27 = vmul.f32 1.442695, %v683_v26 }
 0x50e   : > { %1748 = vpow2.f32 %v686_v27 }
 0x510   : > { %v1747_v28 = vpop.eup %1746 }
 0x511   : > { %v688_v29 = vsel %vm675_vm6, %v1747_v28, 0.0 }
 0x512   : > { %689 = vadd.xlane.f32.xlu0 %v688_v29 }
 0x518   : > { %v1749_v30 = vpop.eup %1748 }
 0x519   : > { %v691_v31 = vsel %vm675_vm6, %v1749_v30, 0.0 }
 0x51a   : > { %692 = vadd.xlane.f32.xlu1 %v691_v31 }
 0x528   : > { %700 = vrot.lane.b32.xlu0 %v1981_v58, %s1818_s11 }
 0x52b   : > { %850 = vrot.lane.b32.xlu1 %v1983_v61, %s1819_s13 }
 0x52c   : > { %798 = vrot.lane.b32.xlu0 %v1981_v58, %s1820_s14 }
 0x52f   : > { %848 = vrot.lane.b32.xlu1 %v1983_v61, %s1820_s14 }
 0x59f   : > { %v690_v35 = vpop.xlane.xlu0 %689 }
 0x5a0   : > { %1750 = vrcp.f32 %v690_v35 }
 0x5a3   : > { %v701_v37 = vpop.permute.xlu0 %700 }
 0x5a4   : > { %v707_v38 = vsel %vm705_vm7, %v701_v37, 0 }
 0x5a5   : > { %1616 = vmatpush3.bf16.msra.mxu1 %v707_v38 }
 0x5a6   : > { %1627 = vmatprep.subr.bf16.mxu1 %v1814_v33 }
 0x5a7   : > { %v693_v39 = vpop.xlane.xlu1 %692  ;;  %v799_v50 = vpop.permute.xlu0 %798 }
 0x5a8   : > { %1752 = vrcp.f32 %v693_v39 }
 0x5aa   : > { %v1751_v40 = vpop.eup %1750 }
 0x5ab   : > { %v696_v41 = vmul.f32 %v1751_v40, %v1747_v28  ;;  %v851_v48 = vpop.permute.xlu1 %850 }
 0x5ac   : > { %v856_v51 = vsel %vm579_vm4, %v851_v48, 0 }
 0x5ad   : > { %v698_v43 = vpack.c.bf16 %v696_v41, %v696_v41  ;;  %v1730_v41 = vld [vmem:[%s1890_s12 + $0x4] ss:$8 sps:$4 sm:$0xff]  }
 0x5af   : > { %1618 = vmatmul.mubr.msk.bf16.vlgmr.msra.gmra.mrb[12].mxu1 %vm675_vm6, %v698_v43  ;;  %v849_v52 = vpop.permute.xlu1 %848 }
 0x5b0   : > { %1628 = vmatpush3.bf16.xpose.msra.mxu1 %v806_v45  ;;  %1629 = vmatprep.mubr.msk.bf16.mxu1 %vm1815_vm3, %v1814_v33 }
 0x5b1   : > { %1639 = vmatprep.subr.bf16.mxu1 %v1814_v33 }
 0x5b2   : > { %v1753_v46 = vpop.eup %1752 }
 0x5b3   : > { %v697_v47 = vmul.f32 %v1753_v46, %v1749_v30 }
 0x5b5   : > { %v699_v49 = vpack.c.bf16 %v697_v47, %v697_v47 }
 0x5b7   : > { %1624 = vmatmul.mubr.msk.bf16.vlgmr.msra.gmra.mrb[0].mxu0 %vm675_vm6, %v699_v49  ;;  %1630 = vmatmul.mubr.msk.bf16.vlgmr.msra.gmra.mrb[16].mxu1 %vm579_vm4, %v799_v50  ;;  %v1733_v49 = vld [vmem:[%s1890_s12 + $0x14] ss:$8 sps:$4 sm:$0xff]  }
 0x5b8   : > { %1634 = vmatpush3.bf16.xpose.msra.mxu0 %v856_v51  ;;  %1635 = vmatprep.mubr.msk.bf16.mxu0 %vm1815_vm3, %v1814_v33 }
 0x5b9   : > { %1645 = vmatprep.subr.bf16.mxu0 %v1814_v33  ;;  %1641 = vmatprep.mubr.msk.bf16.mxu1 %vm1815_vm3, %v1814_v33 }
 0x5bf   : > { %1636 = vmatmul.mubr.msk.bf16.vlgmr.msra.gmra.mrb[4].mxu0 %vm579_vm4, %v849_v52 }
 0x5c0   : > { %1647 = vmatprep.mubr.msk.bf16.mxu0 %vm1815_vm3, %v1814_v33 }
 0x682   : > { %v2033_v53 = vpop.f32.mrb[12].mxu1 }
 0x683   : > { %v1619_v54 = vpop.f32.mrb[13].mxu1 }
 0x684   : > { %v746_v55 = vpop.f32.mrb[14].mxu1  ;;  %v1117_v54 = vsub.s32 4, %v1969_v42 }
 0x685   : > { %v1620_v56 = vpop.f32.mrb[15].mxu1 }
 0x68a   : > { %v2035_v57 = vpop.f32.mrb[0].mxu0  ;;  %v842_v59 = vpop.f32.mrb[16].mxu1 }
 0x68b   : > { %v797_v60 = vpack.c.bf16 %v2035_v57, %v2033_v53  ;;  %v843_v62 = vadd.f32 %v842_v59, %v1999_v5  ;;  %v1625_v63 = vpop.f32.mrb[1].mxu0  ;;  %v1631_v0 = vpop.f32.mrb[17].mxu1  ;;  %v1118_v57 = vrot.slane %v1973_v44, %v1117_v54 }
 0x68c   : > { %v794_v1 = vpop.f32.mrb[2].mxu0  ;;  %v845_v2 = vpop.f32.mrb[18].mxu1 }
 0x68d   : > { %v1626_v3 = vpop.f32.mrb[3].mxu0  ;;  %v1632_v4 = vpop.f32.mrb[19].mxu1  ;;  %v898_v6 = vsel %vm675_vm6, %v843_v62, -inf }
 0x68e   : > { %899 = vmax.xlane.f32.xlu0 %v898_v6 }
 0x692   : > { %v892_v7 = vpop.f32.mrb[4].mxu0 }
 0x693   : > { %v893_v8 = vadd.f32 %v892_v7, %v1999_v5  ;;  %v1637_v9 = vpop.f32.mrb[5].mxu0 }
 0x694   : > { %v895_v10 = vpop.f32.mrb[6].mxu0 }
 0x695   : > { %v1638_v11 = vpop.f32.mrb[7].mxu0  ;;  %v901_v12 = vsel %vm675_vm6, %v893_v8, -inf }
 0x696   : > { %902 = vmax.xlane.f32.xlu1 %v901_v12 }
 0x6a7   : > { %970 = vrot.lane.b32.xlu1 %v1983_v61, %s1821_s16 }
 0x6ab   : > { %1019 = vrot.lane.b32.xlu1 %v1960_v34, %s1822_s17 }
 0x6af   : > { %1066 = vrot.lane.b32.xlu1 %v1954_v32, %s1822_s17 }
 0x71b   : > { %v900_v13 = vpop.xlane.xlu0 %899 }
 0x71c   : > { %v904_v14 = vsub.f32 %v843_v62, %v900_v13 }
 0x71e   : > { %v906_v15 = vmul.f32 1.442695, %v904_v14 }
 0x720   : > { %1754 = vpow2.f32 %v906_v15 }
 0x723   : > { %v903_v16 = vpop.xlane.xlu1 %902 }
 0x724   : > { %v905_v5 = vsub.f32 %v893_v8, %v903_v16 }
 0x726   : > { %v908_v17 = vmul.f32 1.442695, %v905_v5 }
 0x727   : > { %v971_v20 = vpop.permute.xlu1 %970 }
 0x728   : > { %1756 = vpow2.f32 %v908_v17  ;;  %v976_v21 = vsel %vm705_vm7, %v971_v20, 0 }
 0x729   : > { %1646 = vmatpush3.bf16.msra.mxu0 %v976_v21 }
 0x72a   : > { %v1755_v22 = vpop.eup %1754  ;;  %1657 = vmatprep.subr.bf16.mxu0 %v1814_v33 }
 0x72b   : > { %v910_v61 = vsel %vm675_vm6, %v1755_v22, 0.0  ;;  %v1020_v30 = vpop.permute.xlu1 %1019 }
 0x72c   : > { %911 = vadd.xlane.f32.xlu0 %v910_v61 }
 0x72f   : > { %v1067_v36 = vpop.permute.xlu1 %1066 }
 0x732   : > { %v1757_v34 = vpop.eup %1756 }
 0x733   : > { %v913_v32 = vsel %vm675_vm6, %v1757_v34, 0.0 }
 0x734   : > { %914 = vadd.xlane.f32.xlu0 %v913_v32 }
 0x74a   : > { %922 = vrot.lane.b32.xlu0 %v1981_v58, %s1821_s16 }
 0x7b9   : > { %v912_v23 = vpop.xlane.xlu0 %911 }
 0x7ba   : > { %1758 = vrcp.f32 %v912_v23  ;;  %v1155_v23 = vsub.s32 3, %v1969_v42 }
 0x7c1   : > { %v915_v24 = vpop.xlane.xlu0 %914 }
 0x7c2   : > { %1760 = vrcp.f32 %v915_v24 }
 0x7c4   : > { %v1759_v25 = vpop.eup %1758 }
 0x7c5   : > { %v918_v26 = vmul.f32 %v1759_v25, %v1755_v22  ;;  %v923_v27 = vpop.permute.xlu0 %922  ;;  %v1149_v22 = vsub.s32 2, %v1969_v42 }
 0x7c6   : > { %v928_v28 = vsel %vm705_vm7, %v923_v27, 0  ;;  %v1156_v27 = vrot.slane %v1973_v44, %v1155_v23 }
 0x7c7   : > { %1640 = vmatpush3.bf16.msra.mxu1 %v928_v28  ;;  %v920_v29 = vpack.c.bf16 %v918_v26, %v918_v26 }
 0x7c8   : > { %1651 = vmatprep.subr.bf16.mxu1 %v1814_v33 }
 0x7ca   : > { %1642 = vmatmul.mubr.msk.bf16.vlgmr.msra.gmra.mrb[20].mxu1 %vm675_vm6, %v920_v29 }
 0x7cb   : > { %1652 = vmatpush3.bf16.msra.mxu1 %v1020_v30  ;;  %1653 = vmatprep.mubr.msk.bf16.mxu1 %vm1815_vm3, %v1814_v33 }
 0x7cc   : > { %v1761_v58 = vpop.eup %1760  ;;  %1663 = vmatprep.subr.bf16.mxu1 %v1814_v33 }
 0x7cd   : > { %v919_v31 = vmul.f32 %v1761_v58, %v1757_v34  ;;  %v1150_v34 = vrot.slane %v1973_v44, %v1149_v22 }
 0x7cf   : > { %v921_v35 = vpack.c.bf16 %v919_v31, %v919_v31  ;;  %v1734_v31 = vld [vmem:[%s1895_s15] sm:$0xff]  }
 0x7d1   : > { %1648 = vmatmul.mubr.msk.bf16.vlgmr.msra.gmra.mrb[8].mxu0 %vm675_vm6, %v921_v35  ;;  %v1735_v35 = vld [vmem:[%s1895_s15 + $0x8] sm:$0xff]  }
 0x7d2   : > { %1658 = vmatpush3.bf16.msra.mxu0 %v1067_v36  ;;  %1659 = vmatprep.mubr.msk.bf16.mxu0 %vm1815_vm3, %v1814_v33  ;;  %v1736_v36 = vld [vmem:[%s1895_s15 + $0x10] sm:$0xff]  }
 0x7d3   : > { %1671 = vmatprep.subr.bf16.mxu0 %v1814_v33 }
 0x7d9   : > { %1660 = vmatmul.mubr.msk.bf16.vlgmr.msra.gmra.mrb[12].mxu0 %vm579_vm4, %v797_v60 }
 0x7da   : > { %1687 = vmatprep.mubr.msk.bf16.mxu0 %vm1815_vm3, %v1814_v33  ;;  %1672 = vmatpush3.bf16.msra.mxu0 %v1734_v31 }
 0x7db   : > { %1673 = vmatprep.subr.bf16.mxu0 %v1814_v33 }
 0x7de   : > { %1674 = vmatpush3.bf16.msra.mxu0 %v1735_v35  ;;  %v1524_v35 = vld [vmem:[%s2166_s7 + $0x1] ss:$0 sm:$0xff] (!%p1522_p5) }
 0x7df   : > { %1675 = vmatprep.subr.bf16.mxu0 %v1814_v33 }
 0x7e2   : > { %1676 = vmatpush3.bf16.msra.mxu0 %v1736_v36 }
 0x7e3   : > { %1677 = vmatprep.subr.bf16.mxu0 %v1814_v33 }
 0x89d   : > { %v964_v37 = vpop.f32.mrb[20].mxu1 }
 0x89e   : > { %v1643_v38 = vpop.f32.mrb[21].mxu1 }
 0x89f   : > { %v967_v39 = vpop.f32.mrb[22].mxu1  ;;  %v1738_v38 = vld [vmem:[%s1895_s15 + $0x20] sm:$0xff]  }
 0x8a0   : > { %v1644_v40 = vpop.f32.mrb[23].mxu1  ;;  %v1739_v39 = vld [vmem:[%s1895_s15 + $0x28] sm:$0xff]  }
 0x8a1   : > { %v1740_v40 = vld [vmem:[%s1895_s15 + $0x30] sm:$0xff]  }
 0x8a4   : > { %v1012_v43 = vpop.f32.mrb[8].mxu0 }
 0x8a5   : > { %v1018_v45 = vpack.c.bf16 %v1012_v43, %v964_v37  ;;  %v1649_v46 = vpop.f32.mrb[9].mxu0  ;;  %v1737_v37 = vld [vmem:[%s1895_s15 + $0x18] sm:$0xff]   ;;  %v1510_v43 = vld [vmem:[%s342_s19] ss:$0 sm:$0xff] }
 0x8a6   : > { %v1015_v47 = vpop.f32.mrb[10].mxu0  ;;  %1678 = vmatpush3.bf16.msra.mxu0 %v1737_v37 }
 0x8a7   : > { %v1650_v48 = vpop.f32.mrb[11].mxu0  ;;  %1654 = vmatmul.mubr.msk.bf16.vlgmr.msra.gmra.mrb[24].mxu1 %vm579_vm4, %v1018_v45  ;;  %1679 = vmatprep.subr.bf16.mxu0 %v1814_v33 }
 0x8a8   : > { %1664 = vmatpush3.bf16.msra.mxu1 %v1730_v41  ;;  %1667 = vmatprep.mubr.msk.bf16.mxu1 %vm1815_vm3, %v1814_v33  ;;  %v1741_v41 = vld [vmem:[%s1895_s15 + $0x38] sm:$0xff]  }
 0x8a9   : > { %1665 = vmatprep.subr.bf16.mxu1 %v1814_v33 }
 0x8aa   : > { %1680 = vmatpush3.bf16.msra.mxu0 %v1738_v38 }
 0x8ab   : > { %1681 = vmatprep.subr.bf16.mxu0 %v1814_v33 }
 0x8ac   : > { %v1106_v50 = vpop.f32.mrb[12].mxu0  ;;  %1666 = vmatpush3.bf16.msra.mxu1 %v1733_v49 }
 0x8ad   : > { %v1661_v51 = vpop.f32.mrb[13].mxu0 }
 0x8ae   : > { %v1109_v52 = vpop.f32.mrb[14].mxu0  ;;  %1682 = vmatpush3.bf16.msra.mxu0 %v1739_v39 }
 0x8af   : > { %v1662_v53 = vpop.f32.mrb[15].mxu0  ;;  %1683 = vmatprep.subr.bf16.mxu0 %v1814_v33 }
 0x8b2   : > { %1684 = vmatpush3.bf16.msra.mxu0 %v1740_v40 }
 0x8b3   : > { %1685 = vmatprep.subr.bf16.mxu0 %v1814_v33 }
 0x8b6   : > { %1686 = vmatpush3.bf16.msra.mxu0 %v1741_v41 }
 0x97a   : > { %v1059_v55 = vpop.f32.mrb[24].mxu1 }
 0x97b   : > { %v1107_v56 = vadd.f32 %v1106_v50, %v1059_v55  ;;  %v1655_v59 = vpop.f32.mrb[25].mxu1 }
 0x97c   : > { %v1062_v60 = vpop.f32.mrb[26].mxu1 }
 0x97d   : > { %v1113_v62 = vadd.f32 %v1107_v56, %v1941_v18  ;;  %v1110_v63 = vadd.f32 %v1109_v52, %v1062_v60  ;;  %v1656_v0 = vpop.f32.mrb[27].mxu1 }
 0x97f   : > { %v2076_v1 = vadd.f32 %v1118_v57, %v1113_v62  ;;  %v1114_v2 = vadd.f32 %v1110_v63, %v1943_v19 }
 0x981   : > { %v2079_v3 = vadd.f32 %v1118_v57, %v1114_v2  ;;  %v1121_v4 = vsel %vm477_vm2, %v2076_v1, 0.0 }
 0x982   : > { %1122 = vadd.xlane.f32.xlu0 %v1121_v4 }
 0x983   : > { %v1124_v6 = vsel %vm477_vm2, %v2079_v3, 0.0 }
 0x984   : > { %1125 = vadd.xlane.f32.xlu1 %v1124_v6 }
 0xa0f   : > { %v1123_v7 = vpop.xlane.xlu0 %1122 }
 0xa10   : > { %v1127_v8 = vmul.f32 0.03125, %v1123_v7 }
 0xa11   : > { %v1126_v9 = vpop.xlane.xlu1 %1125 }
 0xa12   : > { %v1129_v18 = vsub.f32 %v2076_v1, %v1127_v8  ;;  %v1128_v10 = vmul.f32 0.03125, %v1126_v9 }
 0xa14   : > { %v1130_v11 = vsub.f32 %v2079_v3, %v1128_v10  ;;  %v1131_v12 = vmul.f32 %v1129_v18, %v1129_v18 }
 0xa16   : > { %v1133_v19 = vsel %vm477_vm2, %v1131_v12, 0.0  ;;  %v1132_v13 = vmul.f32 %v1130_v11, %v1130_v11 }
 0xa17   : > { %1134 = vadd.xlane.f32.xlu0 %v1133_v19 }
 0xa18   : > { %v1136_v14 = vsel %vm477_vm2, %v1132_v13, 0.0 }
 0xa1b   : > { %1137 = vadd.xlane.f32.xlu0 %v1136_v14 }
 0xaa4   : > { %v1135_v15 = vpop.xlane.xlu0 %1134 }
 0xaa5   : > { %v1139_v16 = vmul.f32 0.03125, %v1135_v15 }
 0xaa7   : > { %v1141_v5 = vadd.f32 1e-05, %v1139_v16 }
 0xaa8   : > { %v1138_v17 = vpop.xlane.xlu0 %1137 }
 0xaa9   : > { %1762 = vrsqrt.f32 %v1141_v5  ;;  %v1140_v20 = vmul.f32 0.03125, %v1138_v17 }
 0xaab   : > { %v1142_v21 = vadd.f32 1e-05, %v1140_v20 }
 0xaad   : > { %1764 = vrsqrt.f32 %v1142_v21 }
 0xab3   : > { %v1763_v61 = vpop.eup %1762 }
 0xab4   : > { %v1145_v32 = vmul.f32 %v1763_v61, %v1129_v18  ;;  %v1256_v18 = vsub.s32 5, %v1969_v42 }
 0xab6   : > { %v1151_v25 = vmul.f32 %v1150_v34, %v1145_v32  ;;  %v1257_v10 = vrot.slane %v1973_v44, %v1256_v18 }
 0xab7   : > { %v1765_v24 = vpop.eup %1764 }
 0xab8   : > { %v1146_v26 = vmul.f32 %v1765_v24, %v1130_v11  ;;  %v1157_v29 = vadd.f32 %v1156_v27, %v1151_v25 }
 0xaba   : > { %v1152_v28 = vmul.f32 %v1150_v34, %v1146_v26 }
 0xabc   : > { %v1158_v30 = vadd.f32 %v1156_v27, %v1152_v28 }
 0xabe   : > { %v1159_v58 = vpack.c.bf16 %v1158_v30, %v1157_v29 }
 0xac0   : > { %1668 = vmatmul.mubr.msk.bf16.vlgmr.msra.gmra.mrb[28].mxu1 %vm477_vm2, %v1159_v58  ;;  %v1523_v58 = vld [vmem:[%s2166_s7] ss:$0 sm:$0xff] (!%p1522_p5) }
 0xb93   : > { %v1212_v45 = vpop.f32.mrb[28].mxu1 }
 0xb94   : > { %v1213_v46 = vadd.f32 %v1510_v43, %v1212_v45  ;;  %v1669_v47 = vpop.f32.mrb[29].mxu1 }
 0xb95   : > { %v1215_v48 = vpop.f32.mrb[30].mxu1 }
 0xb96   : > { %v1219_v49 = vmul.f32 %v1213_v46, %v1213_v46  ;;  %v1216_v50 = vadd.f32 %v1510_v43, %v1215_v48  ;;  %v1670_v51 = vpop.f32.mrb[31].mxu1 }
 0xb98   : > { %v1221_v52 = vmul.f32 %v1219_v49, %v1213_v46  ;;  %v1220_v53 = vmul.f32 %v1216_v50, %v1216_v50 }
 0xb9a   : > { %v1223_v54 = vmul.f32 0.044715, %v1221_v52  ;;  %v1222_v55 = vmul.f32 %v1220_v53, %v1216_v50 }
 0xb9c   : > { %v1225_v56 = vadd.f32 %v1223_v54, %v1213_v46  ;;  %v1224_v33 = vmul.f32 0.044715, %v1222_v55 }
 0xb9e   : > { %v1227_v57 = vmul.f32 0.7978846, %v1225_v56  ;;  %v1226_v59 = vadd.f32 %v1224_v33, %v1216_v50 }
 0xba0   : > { %1766 = vtanh.f32 %v1227_v57  ;;  %v1228_v60 = vmul.f32 0.7978846, %v1226_v59 }
 0xba2   : > { %1768 = vtanh.f32 %v1228_v60 }
 0xbaa   : > { %v1767_v62 = vpop.eup %1766 }
 0xbab   : > { %v1231_v63 = vadd.f32 1.0, %v1767_v62 }
 0xbac   : > { %v1769_v0 = vpop.eup %1768 }
 0xbad   : > { %v1233_v2 = vmul.f32 0.5, %v1231_v63  ;;  %v1232_v4 = vadd.f32 1.0, %v1769_v0 }
 0xbaf   : > { %v1234_v6 = vmul.f32 0.5, %v1232_v4  ;;  %v1235_v7 = vmul.f32 %v1233_v2, %v1213_v46 }
 0xbb1   : > { %v1236_v8 = vmul.f32 %v1234_v6, %v1216_v50 }
 0xbb3   : > { %v1237_v9 = vpack.c.bf16 %v1236_v8, %v1235_v7 }
 0xbb5   : > { %1688 = vmatmul.mubr.bf16.vlgmr.msra.gmra.mrb[16].mxu0 %v1237_v9 }
 0xc88   : > { %v1340_v11 = vpop.f32.mrb[16].mxu0 }
 0xc89   : > { %v1341_v12 = vadd.f32 %v1340_v11, %v1257_v10  ;;  %v1689_v19 = vpop.f32.mrb[17].mxu0  ;;  %1354 = sbr.rel (%p1522_p5) target bundleno = 3531 (0xdcb), region = 60 }
 0xc8a   : > { %v1343_v13 = vpop.f32.mrb[18].mxu0 }
 0xc8b   : > { %v1347_v14 = vadd.f32 %v1341_v12, %v2076_v1  ;;  %v1344_v15 = vadd.f32 %v1343_v13, %v1257_v10  ;;  %v1690_v16 = vpop.f32.mrb[19].mxu0 }
 0xc8d   : > { %1349 = vst.msk [vmem:[#allocation2] sm:$0xff] %vm477_vm2, %v1347_v14  ;;  %v1348_v5 = vadd.f32 %v1344_v15, %v2079_v3  ;;  %v1357_v42 = vsel (!%p1522_p5), %vm477_vm2, %v1347_v14, 0.0 }
 0xc8e   : > { %1358 = vadd.xlane.f32.xlu0 (!%p1522_p5), %v1357_v42 }
 0xc8f   : > { %1350 = vst.msk [vmem:[#allocation2 + $0x8] sm:$0xff] %vm477_vm2, %v1348_v5  ;;  %v1360_v44 = vsel (!%p1522_p5), %vm477_vm2, %v1348_v5, 0.0 }
 0xc92   : > { %1361 = vadd.xlane.f32.xlu0 %v1360_v44 }
 0xd1b   : > { %v1359_v17 = vpop.xlane.xlu0 %1358 }
 0xd1c   : > { %v1363_v20 = vmul.f32 0.03125, %v1359_v17 }
 0xd1e   : > { %v1365_v1 = vsub.f32 %v1347_v14, %v1363_v20 }
 0xd1f   : > { %v1362_v21 = vpop.xlane.xlu0 %1361 }
 0xd20   : > { %v1364_v22 = vmul.f32 0.03125, %v1362_v21  ;;  %v1367_v61 = vmul.f32 %v1365_v1, %v1365_v1 }
 0xd22   : > { %v1366_v34 = vsub.f32 %v1348_v5, %v1364_v22  ;;  %v1369_v3 = vsel %vm477_vm2, %v1367_v61, 0.0 }
 0xd23   : > { %1370 = vadd.xlane.f32.xlu1 %v1369_v3 }
 0xd24   : > { %v1368_v32 = vmul.f32 %v1366_v34, %v1366_v34 }
 0xd26   : > { %v1372_v23 = vsel %vm477_vm2, %v1368_v32, 0.0 }
 0xd27   : > { %1373 = vadd.xlane.f32.xlu1 %v1372_v23 }
 0xdb0   : > { %v1371_v24 = vpop.xlane.xlu1 %1370 }
 0xdb1   : > { %v1375_v25 = vmul.f32 0.03125, %v1371_v24 }
 0xdb3   : > { %v1377_v26 = vadd.f32 1e-05, %v1375_v25 }
 0xdb4   : > { %v1374_v27 = vpop.xlane.xlu1 %1373 }
 0xdb5   : > { %1770 = vrsqrt.f32 %v1377_v26  ;;  %v1376_v28 = vmul.f32 0.03125, %v1374_v27 }
 0xdb7   : > { %v1378_v29 = vadd.f32 1e-05, %v1376_v28 }
 0xdb9   : > { %1772 = vrsqrt.f32 %v1378_v29 }
 0xdbf   : > { %v1771_v30 = vpop.eup %1770 }
 0xdc0   : > { %v1381_v31 = vmul.f32 %v1771_v30, %v1365_v1 }
 0xdc2   : > { %v1387_v36 = vmul.f32 %v1523_v58, %v1381_v31 }
 0xdc3   : > { %v1773_v37 = vpop.eup %1772 }
 0xdc4   : > { %v1393_v38 = vadd.f32 %v1524_v35, %v1387_v36  ;;  %v1382_v39 = vmul.f32 %v1773_v37, %v1366_v34 }
 0xdc6   : > { %1395 = vst.msk [vmem:[#allocation3] sm:$0xff] %vm477_vm2, %v1393_v38  ;;  %v1388_v40 = vmul.f32 %v1523_v58, %v1382_v39 }
 0xdc8   : > { %v1394_v41 = vadd.f32 %v1524_v35, %v1388_v40 }
 0xdca   : > { %1396 = vst.msk [vmem:[#allocation3 + $0x8] sm:$0xff] %vm477_vm2, %v1394_v41 }
 0xdcb PF: > { %p1695_p6 = scmp.eq.s32.totalorder %s1877_s28, 1  ;;  %s1823_s21 = smov [#allocation3]  }
 0xdcc   : > { %s1403_s23 = sshll.u32 %s1823_s21, 4  ;;  %s1404_s23 = int_to_ptr.vmem [resolvable:$true] %s1403_s23 }
 0xdcd   : > { %s1774_s24 = scalar_lea.vmem %s1404_s23, 256  ;;  %p1781_p10 = scmp.lt.s32.totalorder %s1404_s23, %s1404_s23 }
 0xdce   : > { %p1775_p7 = scmp.ne.s32.totalorder %s1404_s23, %s1774_s24  ;;  %p1782_p11 = scmp.lt.s32.totalorder %s1774_s24, %s1774_s24 }
 0xdd0   : > { %p1776_p8 = pnand %p1775_p7, %p1695_p6  ;;  %p1783_p12 = por %p1782_p11, %p1781_p10 }
 0xdd2   : > { %p1777_p9 = pneg %p1776_p8 }
 0xdd4   : > { %p1784_p13 = pnand %p1783_p12, %p1777_p9 }
 0xdd6   : > { %1787 = shalt.err (!%p1784_p13)
}
 0xdd7   : > { %s1788_s30 = scalar_lea.hbm %s2167_s8, 256 }
 0xdd8   : > { %p1789_p0 = scmp.ne.s32.totalorder %s2167_s8, %s1788_s30  ;;  %p1794_p3 = scmp.lt.u32.totalorder %s1788_s30, %s2167_s8 }
 0xdda   : > { %p1790_p1 = pnand %p1789_p0, %p1695_p6 }
 0xddc   : > { %p1791_p2 = pneg %p1790_p1 }
 0xdde   : > { %p1796_p4 = pnand %p1794_p3, %p1791_p2 }
 0xde0   : > { %1799 = shalt.err (!%p1796_p4)
}
 0xde1   : > { %s1824_s13 = smov 128   ;;  %s1825_s14 = smov 8  }
 0xde2   : > { %1692 = dma.vmem_to_hbm [thread:$0]  (%p1695_p6), %s1404_s23, 256, %s2167_s8, [#allocation4], %s1824_s13, %s1824_s13, %s1825_s14  }
 0xde3   : > { %1805 = dma.done.wait (%p1695_p6), [#allocation4], 256  }
 0xde4   : > { %1807 = vsyncadd (%p1695_p6), [#allocation4], 4294967040 }
 0xde5 PF: > { %s19_s27 = sadd.s32 1, %s1810_s27  }
 0xde6   : > { %p16_p5 = scmp.ge.s32.totalorder %s19_s27, 4  }
 0xde8   :  { %18 = sbr.rel (!%p16_p5) target bundleno = 1 (0x1), region = 96 }
 0xdef   :  { %1419 = vsyncpa [#allocation4], 1 }
 0xdf0   :  { %1421 = vsyncpa [#allocation4 + $0x1], 1 }

</bundles_post_ra>
